<compile_context>
chip_gen: v7x
topology: tpu7x:2x2x1
jax: 0.10.0
libtpu: 0.0.40
codegen_flags: <defaults>
</compile_context>

<pallas_src>
import jax
import jax.numpy as jnp
from jax.experimental import pallas as pl
from jax.experimental.pallas import tpu as pltpu


def autopad(k, p=None):
    if p is None:
        p = k // 2 if isinstance(k, int) else [x // 2 for x in k]
    return p


def _round_up(x, m):
    return ((x + m - 1) // m) * m


def _make_convsqu_kernel(nb, hwp, act=True):
    def kernel(w_ref, col_ref, o_ref):
        # w_ref:   (C2, KKCp)        bf16 weight slab (rows = out channels)
        # col_ref: (KKCp, nb*HWp)    bf16 im2col tile (batch folded onto lanes)
        # o_ref:   (nb, C2, HWp)     lane-dense output
        acc = jnp.dot(w_ref[...], col_ref[...],
                      preferred_element_type=jnp.float32)      # (C2, nb*HWp) f32

        if act:
            # SiLU in float32 (EUP sigmoid + VPU multiply).
            acc = acc * jax.nn.sigmoid(acc)

        acc = acc.astype(o_ref.dtype)
        for b in range(nb):
            # Static, lane-aligned slices (HWp is a multiple of 128) -> unmasked vst.
            o_ref[b] = acc[:, b * hwp:(b + 1) * hwp]

    return kernel


def conv_squ(x_nchw, weight_oikk, k=3, s=1, p=None, act=True,
             batch_block=None, compute_dtype=jnp.bfloat16, out_dtype=None):
    """ConvSqu forward: SiLU(Conv2d(x)), bias=False, groups=1, stride=1.

    x_nchw:      (N, C1, H, W)  float32
    weight_oikk: (C2, C1, k, k) float32  (PyTorch conv weight layout)
    """
    assert s == 1, "only stride 1 implemented"
    p = autopad(k, p)
    N, C1, H, W = x_nchw.shape
    C2 = weight_oikk.shape[0]
    assert weight_oikk.shape[1] == C1, "groups != 1 not implemented"
    Ho = (H + 2 * p - k) // s + 1
    Wo = (W + 2 * p - k) // s + 1
    HW = Ho * Wo
    HWp = _round_up(HW, 128)            # lane-dense output / unmasked stores
    KKC = k * k * C1
    KKCp = _round_up(KKC, 16)           # bf16 sublane packing; pad K once here
    out_dtype = x_nchw.dtype if out_dtype is None else out_dtype

    # Batch folding: keep >= 2 "parallel" grid steps (v7x megacore) when N >= 2,
    # but fold the rest of the batch into the matmul N dimension.
    if batch_block is None:
        batch_block = max(1, N // 2)
    nb = max(1, min(batch_block, N))
    num_blocks = -(-N // nb)            # cdiv
    Np = num_blocks * nb

    # ---- wrapper-side glue (plain JAX, once per call) -----------------------
    # Padded NCHW input in bf16 (no NHWC transpose needed anymore).
    xq = x_nchw.astype(compute_dtype)
    x_pad = jnp.pad(xq, ((0, Np - N), (0, 0), (p, p), (p, p)))

    # im2col: rows are (c1, kh, kw)-major to match weight.reshape(C2, C1*k*k).
    pieces = []
    for kh in range(k):
        for kw in range(k):
            pieces.append(x_pad[:, :, kh:kh + Ho, kw:kw + Wo])   # (Np, C1, Ho, Wo)
    col = jnp.stack(pieces, axis=0).reshape(k * k, Np, C1, HW)   # (kk, Np, C1, HW)
    col = jnp.transpose(col, (2, 0, 1, 3)).reshape(KKC, Np, HW)  # (KKC, Np, HW)
    col = jnp.pad(col, ((0, KKCp - KKC), (0, 0), (0, HWp - HW)))
    col = col.reshape(KKCp, Np * HWp)                            # batch-major lanes

    # Weight slab: (C2, KKCp), columns (c1, kh, kw)-major, zero-padded K.
    w = weight_oikk.reshape(C2, KKC).astype(compute_dtype)
    w = jnp.pad(w, ((0, 0), (0, KKCp - KKC)))

    # ---- Pallas kernel: pure matmul + SiLU, lane-dense output ---------------
    out = pl.pallas_call(
        _make_convsqu_kernel(nb, HWp, act=act),
        out_shape=jax.ShapeDtypeStruct((Np, C2, HWp), out_dtype),
        grid_spec=pltpu.PrefetchScalarGridSpec(
            num_scalar_prefetch=0,
            grid=(num_blocks,),
            in_specs=[
                pl.BlockSpec((C2, KKCp), lambda i: (0, 0)),
                pl.BlockSpec((KKCp, nb * HWp), lambda i: (0, i)),
            ],
            out_specs=pl.BlockSpec((nb, C2, HWp), lambda i: (i, 0, 0)),
        ),
        compiler_params=pltpu.CompilerParams(
            dimension_semantics=("parallel",)),
    )(w, col)

    # Crop batch / spatial padding; (N, C2, HW) -> NCHW is a free reshape.
    return out[:N, :, :HW].reshape(N, C2, Ho, Wo)


def _reference(x_nchw, weight_oikk, k=3, s=1, p=None, act=True):
    p = autopad(k, p)
    y = jax.lax.conv_general_dilated(
        x_nchw, weight_oikk,
        window_strides=(s, s),
        padding=((p, p), (p, p)),
        dimension_numbers=("NCHW", "OIHW", "NCHW"))
    if act:
        y = y * jax.nn.sigmoid(y)
    return y


if __name__ == "__main__":
    # Module config: ConvSqu(c1=4, c2=8, k=3, s=1) -> conv weight (8, 4, 3, 3), no bias.
    N, C1, C2, H, W, K = 2, 4, 8, 16, 16, 3

    key = jax.random.PRNGKey(0)
    kx, kw = jax.random.split(key)
    x = jax.random.normal(kx, (N, C1, H, W), dtype=jnp.float32)
    fan_in = C1 * K * K
    bound = (1.0 / fan_in) ** 0.5
    weight = jax.random.uniform(kw, (C2, C1, K, K), dtype=jnp.float32,
                                minval=-bound, maxval=bound)

    fwd = jax.jit(lambda xx, ww: conv_squ(xx, ww, k=K, s=1, act=True))
    out = jax.block_until_ready(fwd(x, weight))
    assert out.shape == (N, C2, H, W)

    # Tight check: reference computed with the same bf16 operand quantization
    # (f32 accumulate) -> should match to accumulation-order noise.
    ref_q = _reference(x.astype(jnp.bfloat16).astype(jnp.float32),
                       weight.astype(jnp.bfloat16).astype(jnp.float32),
                       k=K, s=1, act=True)
    assert jnp.allclose(out, ref_q, atol=1e-3, rtol=1e-3), \
        "mismatch vs bf16-quantized reference conv"

    # Sanity check vs exact f32 semantics (bf16 operand rounding only).
    ref = _reference(x, weight, k=K, s=1, act=True)
    assert jnp.allclose(out, ref, atol=5e-2, rtol=5e-2), \
        "mismatch vs f32 reference conv"

    print("KERNEL_OK")
</pallas_src>

<mosaic_0001>
module attributes {stable_mosaic.version = 11 : i64} {
  func.func @kernel(%arg0: i32, %arg1: memref<8x48xbf16, #tpu.memory_space<vmem>>, %arg2: memref<48x256xbf16, #tpu.memory_space<vmem>>, %arg3: memref<1x8x256xf32, #tpu.memory_space<vmem>>) attributes {dimension_semantics = [#tpu.dimension_semantics<parallel>], iteration_bounds = array<i64: 2>, scalar_prefetch = 0 : i64, scratch_operands = 0 : i64, tpu.core_type = #tpu.core_type<tc>, window_params = [{pipeline_mode = #tpu.pipeline_mode<synchronous>, transform_indices = @transform_0, window_bounds = array<i64: 8, 48>}, {transform_indices = @transform_1, window_bounds = array<i64: 48, 256>}, {transform_indices = @transform_2, window_bounds = array<i64: 1, 8, 256>}]} {
    %c0 = arith.constant 0 : index
    %c0_0 = arith.constant 0 : index
    %0 = vector.load %arg1[%c0, %c0_0] : memref<8x48xbf16, #tpu.memory_space<vmem>>, vector<8x48xbf16>
    %c0_1 = arith.constant 0 : index
    %c0_2 = arith.constant 0 : index
    %1 = vector.load %arg2[%c0_1, %c0_2] : memref<48x256xbf16, #tpu.memory_space<vmem>>, vector<48x256xbf16>
    %cst = arith.constant dense<0.000000e+00> : vector<8x256xf32>
    %2 = tpu.matmul %0, %1, %cst {dimension_numbers = #tpu.dot_dimension_numbers<[1], [0], [0], [1], [0, 0, 1, 1], [], []>} : vector<8x48xbf16>, vector<48x256xbf16>, vector<8x256xf32> -> vector<8x256xf32>
    %3 = arith.negf %2 : vector<8x256xf32>
    %4 = math.exp %3 : vector<8x256xf32>
    %cst_3 = arith.constant 1.000000e+00 : f32
    %5 = vector.broadcast %cst_3 : f32 to vector<8x256xf32>
    %6 = arith.addf %5, %4 : vector<8x256xf32>
    %7 = arith.divf %5, %6 : vector<8x256xf32>
    %8 = arith.mulf %2, %7 : vector<8x256xf32>
    %c0_4 = arith.constant 0 : index
    %c0_5 = arith.constant 0 : index
    %c0_6 = arith.constant 0 : index
    %9 = vector.load %arg3[%c0_4, %c0_5, %c0_6] : memref<1x8x256xf32, #tpu.memory_space<vmem>>, vector<1x8x256xf32>
    %10 = vector.shape_cast %9 : vector<1x8x256xf32> to vector<8x256xf32>
    %11 = vector.shape_cast %8 : vector<8x256xf32> to vector<1x8x256xf32>
    tpu.vector_store %arg3[%c0_4, %c0_5, %c0_6], %11 {strides = array<i32>} : memref<1x8x256xf32, #tpu.memory_space<vmem>>, vector<1x8x256xf32>,
    return
  }
  func.func @transform_0(%arg0: i32) -> (i32, i32) {
    %c0_i32 = arith.constant 0 : i32
    %c0_i32_0 = arith.constant 0 : i32
    %c0_i32_1 = arith.constant 0 : i32
    return %c0_i32, %c0_i32_0 : i32, i32
  }
  func.func @transform_1(%arg0: i32) -> (i32, i32) {
    %c0_i32 = arith.constant 0 : i32
    %c0_i32_0 = arith.constant 0 : i32
    return %c0_i32, %arg0 : i32, i32
  }
  func.func @transform_2(%arg0: i32) -> (i32, i32, i32) {
    %c0_i32 = arith.constant 0 : i32
    %c0_i32_0 = arith.constant 0 : i32
    %c0_i32_1 = arith.constant 0 : i32
    return %arg0, %c0_i32, %c0_i32_0 : i32, i32, i32
  }
}

</mosaic_0001>

<bundles_post_ra>
// kernel: _lambda_.1
= control target key start
LH: loop header
LB: loop body
LE: loop exit
PB: predicated region body
PF: predicated region fallthrough
CT: control target
= control target key end

     0   :  { %s466_s9 = smov 0   ;;  %s468_s10 = smov 0   ;;  %s523_s0 = inlined_call_operand.vmem [shape: bf16[8,48], index: 0, kind: input, shape index: {}]   ;;  %s524_s1 = inlined_call_operand.vmem [shape: bf16[48,512], index: 1, kind: input, shape index: {}]   ;;  %s525_s2 = inlined_call_operand.vmem [shape: f32[2,8,256], index: 2, kind: output, shape index: {}]  }
   0x1   :  { %s470_s11 = smov 0  }
   0x2 LB: > { %s360_s12 = sadd.s32 4294967295, %s448_s11   ;;  %s483_s13 = sadd.s32 1, %s448_s11   ;;  %s448_s11 = sphi %s470_s11, %s528_s11   ;;  %s444_s10 = sphi %s468_s10, %s527_s10   ;;  %s440_s9 = sphi %s466_s9, %s526_s9  }
   0x3   : > { %s37_s14 = ssub.s32 %s448_s11, %s483_s13  ;;  %s40_s15 = sadd.s32 1, %s444_s10 }
   0x4   : > { %p38_p0 = scmp.eq.s32.totalorder %s37_s14, 0  ;;  %p47_p1 = scmp.ne.s32.totalorder %s444_s10, %s440_s9 }
   0x5   : > { %p48_p2 = scmp.eq.s32.totalorder %s448_s11, 0  ;;  %p363_p4 = scmp.ge.s32.totalorder %s448_s11, 2 }
   0x6   : > { %s492_s16 = scalar_select %p38_p0, %s444_s10, %s40_s15  }
   0x7   : > { %p49_p3 = por %p48_p2, %p47_p1  ;;  %102 = sbr.rel (%p363_p4) target bundleno = 21 (0x15), region = 20 }
   0xe   : > { %105 = sbr.rel (!%p49_p3) target bundleno = 21 (0x15), region = 24  ;;  %s107_s17 = sand.u32 (%p49_p3), 1, %s444_s10  }
   0xf   : > { %s380_s18 = sshll.u32 (%p49_p3), %s448_s11, 3  ;;  %s382_s19 = smul.u32 (%p49_p3), 48, %s107_s17 }
  0x10   : > { %s112_s22 = scalar_lea.vmem (%p49_p3), %s524_s1, %s380_s18 }
  0x11   : > { %v150_v0 = vld [vmem:[%s112_s22] sm:$0xff] (%p49_p3)  ;;  %v152_v1 = vld [vmem:[%s112_s22 + $0x10] sm:$0xff] (%p49_p3)  ;;  %s109_s23 = scalar_lea.vmem (%p49_p3), [#allocation2], %s382_s19 }
  0x12   : > { %v154_v2 = vld [vmem:[%s112_s22 + $0x20] sm:$0xff] (%p49_p3)  ;;  %v156_v3 = vld [vmem:[%s112_s22 + $0x30] sm:$0xff] (%p49_p3)  ;;  %151 = vst [vmem:[%s109_s23] sm:$0xff] (%p49_p3), %v150_v0  ;;  %153 = vst [vmem:[%s109_s23 + $0x8] sm:$0xff] (%p49_p3), %v152_v1 }
  0x13   : > { %v158_v4 = vld [vmem:[%s112_s22 + $0x40] sm:$0xff] (%p49_p3)  ;;  %v160_v5 = vld [vmem:[%s112_s22 + $0x50] sm:$0xff] (%p49_p3)  ;;  %155 = vst [vmem:[%s109_s23 + $0x10] sm:$0xff] (%p49_p3), %v154_v2  ;;  %157 = vst [vmem:[%s109_s23 + $0x18] sm:$0xff] (%p49_p3), %v156_v3 }
  0x14   : > { %159 = vst [vmem:[%s109_s23 + $0x20] sm:$0xff] (%p49_p3), %v158_v4  ;;  %161 = vst [vmem:[%s109_s23 + $0x28] sm:$0xff] (%p49_p3), %v160_v5 }
  0x15 PF: > { %p366_p5 = scmp.ge.s32.totalorder %s448_s11, 1  ;;  %p166_p6 = scmp.lt.s32.totalorder %s448_s11, 3 }
  0x17   : > { %p167_p7 = pnand %p366_p5, %p166_p6 }
  0x18   : > { %s173_s24 = sand.u32 (!%p167_p7), 1, %s440_s9   ;;  %v450_v6 = vmov (!%p167_p7), 0   ;;  %v201_v13 = vld [vmem:[%s523_s0] sm:$0xf] (!%p167_p7)  ;;  %vm238_vm0 = vcmask (!%p167_p7), 392192   ;;  %p195_p8 = scmp.lt.s32.totalorder (!%p167_p7), %s360_s12, 1 }
  0x19   : > { %170 = sbr.rel (%p167_p7) target bundleno = 284 (0x11c), region = 62  ;;  %274 = vmatprep.mubr.bf16.mxu0 (!%p167_p7), %v450_v6 }
  0x1a   : > { %s383_s25 = smul.u32 (!%p167_p7), 48, %s173_s24 }
  0x1c   : > { %s175_s26 = scalar_lea.vmem (!%p167_p7), [#allocation2], %s383_s25 }
  0x1d   : > { %v409_v7 = vld [vmem:[%s175_s26 + $0x4] ss:$8 sps:$4 sm:$0xff] (!%p167_p7)   ;;  %v411_v8 = vld [vmem:[%s175_s26] ss:$8 sps:$4 sm:$0xff] (!%p167_p7)   ;;  %v412_v9 = vld [vmem:[%s175_s26 + $0x14] ss:$8 sps:$4 sm:$0xff] (!%p167_p7)  }
  0x1e   : > { %242 = vmatprep.subr.bf16.mxu0 (!%p167_p7), %v409_v7  ;;  %v414_v10 = vld [vmem:[%s175_s26 + $0x10] ss:$8 sps:$4 sm:$0xff] (!%p167_p7)   ;;  %v415_v11 = vld [vmem:[%s175_s26 + $0x24] ss:$8 sps:$4 sm:$0xff] (!%p167_p7)   ;;  %v417_v12 = vld [vmem:[%s175_s26 + $0x20] ss:$8 sps:$4 sm:$0xff] (!%p167_p7)  }
  0x1f   : > { %243 = vmatpush1.bf16.msra.mxu0 (!%p167_p7), %v411_v8 }
  0x20   : > { %244 = vmatprep.subr.bf16.mxu0 %v412_v9  ;;  %s530_s12 = smov (!%p195_p8, %s360_s12), 1 }
  0x21   : > { %s381_s29 = sshll.u32 %s530_s12, 4 }
  0x22   : > { %s199_s4 = scalar_lea.vmem %s525_s2, %s381_s29 }
  0x23   : > { %245 = vmatpush1.bf16.msra.mxu0 %v414_v10 }
  0x24   : > { %246 = vmatprep.subr.bf16.mxu0 %v415_v11 }
  0x27   : > { %247 = vmatpush1.bf16.msra.mxu0 %v417_v12 }
  0x2a   : > { %375 = vmatmul.mubr.msk.bf16.vlgmr.msra.gmra.mrb[0].mxu0 %vm238_vm0, %v201_v13 }
  0xfd   : > { %v276_v14 = vpop.f32.mrb[0].mxu0 }
  0xfe   : > { %v376_v15 = vmul.f32 -1.442695, %v276_v14  ;;  %v278_v16 = vpop.f32.mrb[1].mxu0 }
  0xff   : > { %v377_v17 = vmul.f32 -1.442695, %v278_v16  ;;  %v280_v18 = vpop.f32.mrb[2].mxu0 }
 0x100   : > { %418 = vpow2.f32 %v376_v15  ;;  %v281_v19 = vpop.f32.mrb[3].mxu0 }
 0x101   : > { %420 = vpow2.f32 %v377_v17 }
 0x10a   : > { %v419_v20 = vpop.eup %418 }
 0x10b   : > { %v421_v21 = vpop.eup %420  ;;  %v289_v22 = vadd.f32 1.0, %v419_v20 }
 0x10c   : > { %v290_v23 = vadd.f32 1.0, %v421_v21 }
 0x10d   : > { %422 = vrcp.f32 %v289_v22 }
 0x10e   : > { %424 = vrcp.f32 %v290_v23 }
 0x117   : > { %v423_v24 = vpop.eup %422 }
 0x118   : > { %v425_v25 = vpop.eup %424  ;;  %v295_v26 = vmul.f32 %v423_v24, %v276_v14 }
 0x119   : > { %v296_v27 = vmul.f32 %v425_v25, %v278_v16 }
 0x11a   : > { %297 = vst [vmem:[%s199_s4] sm:$0xff] %v295_v26 }
 0x11b   : > { %298 = vst [vmem:[%s199_s4 + $0x8] sm:$0xff] %v296_v27 }
 0x11c PF: > { %p9_p9 = scmp.ge.s32.totalorder %s483_s13, 4   ;;  %s526_s9 = smov %s444_s10 }
 0x11d   : > { %s527_s10 = smov %s492_s16  ;;  %s528_s11 = smov %s483_s13 }
 0x11e   :  { %11 = sbr.rel (!%p9_p9) target bundleno = 2 (0x2), region = 101 }

</bundles_post_ra>
